<compile_context>
chip_gen: v6e
topology: v6e:2x2x1
jax: 0.10.0
libtpu: 0.0.40
codegen_flags: <defaults>
</compile_context>

<pallas_src>
import math
from typing import NamedTuple

import jax
import jax.numpy as jnp
from jax import lax
from jax.experimental import pallas as pl
from jax.experimental.pallas import tpu as pltpu


def _round8(n: int) -> int:
    return -(-n // 8) * 8


class SlabLayout(NamedTuple):
    in_dim: int
    hid: int
    width: int
    w1x: int   # rows [w1x, w1x+in_dim)      lin1 weight, x part, (in, out) layout
    w1t: int   # row  w1t                    lin1 weight, time row
    b1: int    # row  b1
    w2: int    # rows [w2, w2+hid)           lin2 weight, (in, out) layout
    b2: int    # row  b2
    w3: int    # rows [w3, w3+hid)           lin3 weight, (in, out) layout (cols [:in_dim])
    b3: int    # row  b3 (cols [:in_dim])
    rows: int


def _slab_layout(in_dim: int, hid: int) -> SlabLayout:
    w1x = 0
    w1t = w1x + _round8(in_dim)
    b1 = w1t + 8
    w2 = b1 + 8
    b2 = w2 + _round8(hid)
    w3 = b2 + 8
    b3 = w3 + _round8(hid)
    rows = b3 + 8
    return SlabLayout(in_dim, hid, max(in_dim, hid),
                      w1x, w1t, b1, w2, b2, w3, b3, rows)


def pack_nnodef_params(params, in_dim: int, hid: int):
    """One-time packing of all weights/biases into a single (rows, width) f32 slab.

    PyTorch nn.Linear stores weight as (out, in); we transpose to (in, out) so
    every in-kernel matmul is a plain jnp.dot with no in-kernel transpose.
    lin1's weight is split into its x rows and its time row (the last input
    column, matching cat([x, t], dim=-1) order).
    """
    lay = _slab_layout(in_dim, hid)
    slab = jnp.zeros((lay.rows, lay.width), jnp.float32)

    w1 = params["w1"].astype(jnp.float32).T                  # (in_dim + 1, hid)
    slab = slab.at[lay.w1x:lay.w1x + in_dim, :hid].set(w1[:in_dim])
    slab = slab.at[lay.w1t, :hid].set(w1[in_dim])
    slab = slab.at[lay.b1, :hid].set(params["b1"].astype(jnp.float32))
    slab = slab.at[lay.w2:lay.w2 + hid, :hid].set(params["w2"].astype(jnp.float32).T)
    slab = slab.at[lay.b2, :hid].set(params["b2"].astype(jnp.float32))
    slab = slab.at[lay.w3:lay.w3 + hid, :in_dim].set(params["w3"].astype(jnp.float32).T)
    slab = slab.at[lay.b3, :in_dim].set(params["b3"].astype(jnp.float32))
    return slab, lay


def _elu(v):
    # ELU(alpha=1): v if v > 0 else exp(v) - 1.  The exp argument is clamped so
    # the unselected branch never produces inf.
    # TODO(synk): lax.expm1 would be marginally more accurate for small
    # negative v (same EUP slot); kept as the verified exp-1 form since the
    # delta is ~1e-7 in f32.
    return jnp.where(v > 0, v, jnp.exp(jnp.minimum(v, 0.0)) - 1.0)


def _mlp(x, t, w_ref, lay: SlabLayout):
    """cat([x, t]) -> lin1 -> ELU -> lin2 -> ELU -> lin3, from the packed slab.

    Static ref slices (8-row-aligned segment starts) carve the slab at zero
    runtime cost; the time-channel contribution is folded in as t * w1t.
    """
    d, h = lay.in_dim, lay.hid
    w1x = w_ref[lay.w1x:lay.w1x + d, :h]
    w1t = w_ref[lay.w1t:lay.w1t + 1, :h]
    b1 = w_ref[lay.b1:lay.b1 + 1, :h]
    w2 = w_ref[lay.w2:lay.w2 + h, :h]
    b2 = w_ref[lay.b2:lay.b2 + 1, :h]
    w3 = w_ref[lay.w3:lay.w3 + h, :d]
    b3 = w_ref[lay.b3:lay.b3 + 1, :d]

    z = jnp.dot(x, w1x, preferred_element_type=jnp.float32) + t * w1t + b1
    z = _elu(z)
    z = _elu(jnp.dot(z, w2, preferred_element_type=jnp.float32) + b2)
    return jnp.dot(z, w3, preferred_element_type=jnp.float32) + b3


def nnodef_forward(x, t, slab, lay: SlabLayout):
    """Single f(x, t) evaluation.  x: (B, in_dim) f32, t: scalar or (B, 1)."""
    B, in_dim = x.shape
    assert in_dim == lay.in_dim
    x = x.astype(jnp.float32)
    t = jnp.broadcast_to(jnp.asarray(t, jnp.float32).reshape(-1, 1), (B, 1))

    def kernel(x_ref, t_ref, w_ref, out_ref):
        out_ref[...] = _mlp(x_ref[...], t_ref[...], w_ref, lay)

    vmem = pl.BlockSpec(memory_space=pltpu.MemorySpace.VMEM)
    # TODO(synk): for large B, add a 1-D parallel batch grid (v7x megacore) and
    # a batch-on-lanes layout; unnecessary at toy sizes where launch+DMA dominate.
    return pl.pallas_call(
        kernel,
        out_shape=jax.ShapeDtypeStruct((B, in_dim), jnp.float32),
        in_specs=[vmem, vmem, vmem],
        out_specs=vmem,
    )(x, t, slab)


def nnodef_euler(x0, t0, dt, n_steps, slab, lay: SlabLayout):
    """Fused explicit-Euler rollout: n_steps evaluations of f(x, t) in ONE
    pallas_call with the ~13 KB weight slab resident in VMEM (amortizes the
    per-evaluation launch + weight-DMA cost flagged in the review)."""
    B, in_dim = x0.shape
    assert in_dim == lay.in_dim
    x0 = x0.astype(jnp.float32)
    t0 = jnp.broadcast_to(jnp.asarray(t0, jnp.float32).reshape(-1, 1), (B, 1))
    dt = float(dt)
    n_steps = int(n_steps)

    def kernel(x_ref, t0_ref, w_ref, out_ref):
        t_start = t0_ref[...]

        def body(i, x):
            t = t_start + jnp.float32(dt) * i
            return x + jnp.float32(dt) * _mlp(x, t, w_ref, lay)

        out_ref[...] = lax.fori_loop(0, n_steps, body, x_ref[...],
                                     unroll=(n_steps <= 16))

    vmem = pl.BlockSpec(memory_space=pltpu.MemorySpace.VMEM)
    return pl.pallas_call(
        kernel,
        out_shape=jax.ShapeDtypeStruct((B, in_dim), jnp.float32),
        in_specs=[vmem, vmem, vmem],
        out_specs=vmem,
    )(x0, t0, slab)


def _reference_forward(x, t, params):
    """Pure-JAX reference mirroring the PyTorch module."""
    B = x.shape[0]
    t = jnp.broadcast_to(jnp.asarray(t, jnp.float32).reshape(-1, 1), (B, 1))
    xt = jnp.concatenate([x.astype(jnp.float32), t], axis=-1)
    h = jax.nn.elu(xt @ params["w1"].T + params["b1"])
    h = jax.nn.elu(h @ params["w2"].T + params["b2"])
    return h @ params["w3"].T + params["b3"]


def _reference_euler(x, t0, dt, n_steps, params):
    x = x.astype(jnp.float32)
    t0 = jnp.asarray(t0, jnp.float32).reshape(-1, 1)
    for i in range(n_steps):
        x = x + dt * _reference_forward(x, t0 + dt * i, params)
    return x


def _init_params(in_dim, hid_dim, key):
    """nn.Linear default init: kaiming_uniform(a=sqrt(5)) => U(+/- 1/sqrt(fan_in))."""
    ks = jax.random.split(key, 6)

    def linear(kw, kb, fan_in, fan_out):
        bound = 1.0 / math.sqrt(fan_in)
        w = jax.random.uniform(kw, (fan_out, fan_in), jnp.float32, -bound, bound)
        b = jax.random.uniform(kb, (fan_out,), jnp.float32, -bound, bound)
        return w, b

    w1, b1 = linear(ks[0], ks[1], in_dim + 1, hid_dim)   # lin1: (in+1) -> hid
    w2, b2 = linear(ks[2], ks[3], hid_dim, hid_dim)      # lin2: hid -> hid
    w3, b3 = linear(ks[4], ks[5], hid_dim, in_dim)       # lin3: hid -> in
    return {"w1": w1, "b1": b1, "w2": w2, "b2": b2, "w3": w3, "b3": b3}


if __name__ == "__main__":
    B, in_dim, hid_dim = 8, 4, 32
    key = jax.random.PRNGKey(0)
    kp, kx, kt = jax.random.split(key, 3)
    params = _init_params(in_dim, hid_dim, kp)
    x = jax.random.normal(kx, (B, in_dim), jnp.float32)
    t = jax.random.uniform(kt, (B, 1), jnp.float32)

    # One-time weight packing (hoisted out of the per-evaluation path).
    slab, lay = pack_nnodef_params(params, in_dim, hid_dim)
    slab = jax.block_until_ready(slab)

    # Single forward evaluation (3 operands: x, t, packed weights).
    out = jax.block_until_ready(nnodef_forward(x, t, slab, lay))
    ref = jax.block_until_ready(_reference_forward(x, t, params))
    assert out.shape == (B, in_dim) and out.dtype == jnp.float32
    err = float(jnp.max(jnp.abs(out - ref)))
    assert err < 1e-4, f"forward mismatch vs reference: {err}"

    # Fused Euler rollout: 8 f(x, t) evaluations in a single pallas_call.
    dt, n_steps = 0.05, 8
    out_e = jax.block_until_ready(nnodef_euler(x, t, dt, n_steps, slab, lay))
    ref_e = jax.block_until_ready(_reference_euler(x, t, dt, n_steps, params))
    err_e = float(jnp.max(jnp.abs(out_e - ref_e)))
    assert err_e < 1e-4, f"euler rollout mismatch vs reference: {err_e}"

    print("KERNEL_OK")
</pallas_src>

<mosaic_0001>
module attributes {stable_mosaic.version = 11 : i64} {
  func.func @kernel(%arg0: memref<8x4xf32, #tpu.memory_space<vmem>>, %arg1: memref<8x1xf32, #tpu.memory_space<vmem>>, %arg2: memref<104x32xf32, #tpu.memory_space<vmem>>, %arg3: memref<8x4xf32, #tpu.memory_space<vmem>>) attributes {dimension_semantics = [], scalar_prefetch = 0 : i64, scratch_operands = 0 : i64, tpu.core_type = #tpu.core_type<tc>} {
    %c0 = arith.constant 0 : index
    %c0_0 = arith.constant 0 : index
    %0 = vector.load %arg0[%c0, %c0_0] : memref<8x4xf32, #tpu.memory_space<vmem>>, vector<8x4xf32>
    %c0_1 = arith.constant 0 : index
    %c0_2 = arith.constant 0 : index
    %1 = vector.load %arg1[%c0_1, %c0_2] : memref<8x1xf32, #tpu.memory_space<vmem>>, vector<8x1xf32>
    %c0_3 = arith.constant 0 : index
    %c0_4 = arith.constant 0 : index
    %2 = vector.load %arg2[%c0_3, %c0_4] : memref<104x32xf32, #tpu.memory_space<vmem>>, vector<4x32xf32>
    %c8 = arith.constant 8 : index
    %c0_5 = arith.constant 0 : index
    %3 = vector.load %arg2[%c8, %c0_5] : memref<104x32xf32, #tpu.memory_space<vmem>>, vector<1x32xf32>
    %c16 = arith.constant 16 : index
    %c0_6 = arith.constant 0 : index
    %4 = vector.load %arg2[%c16, %c0_6] : memref<104x32xf32, #tpu.memory_space<vmem>>, vector<1x32xf32>
    %c24 = arith.constant 24 : index
    %c0_7 = arith.constant 0 : index
    %5 = vector.load %arg2[%c24, %c0_7] : memref<104x32xf32, #tpu.memory_space<vmem>>, vector<32x32xf32>
    %c56 = arith.constant 56 : index
    %c0_8 = arith.constant 0 : index
    %6 = vector.load %arg2[%c56, %c0_8] : memref<104x32xf32, #tpu.memory_space<vmem>>, vector<1x32xf32>
    %c64 = arith.constant 64 : index
    %c0_9 = arith.constant 0 : index
    %7 = vector.load %arg2[%c64, %c0_9] : memref<104x32xf32, #tpu.memory_space<vmem>>, vector<32x4xf32>
    %c96 = arith.constant 96 : index
    %c0_10 = arith.constant 0 : index
    %8 = vector.load %arg2[%c96, %c0_10] : memref<104x32xf32, #tpu.memory_space<vmem>>, vector<1x4xf32>
    %cst = arith.constant dense<0.000000e+00> : vector<8x32xf32>
    %9 = tpu.matmul %0, %2, %cst {dimension_numbers = #tpu.dot_dimension_numbers<[1], [0], [0], [1], [0, 0, 1, 1], [], []>} : vector<8x4xf32>, vector<4x32xf32>, vector<8x32xf32> -> vector<8x32xf32>
    %10 = vector.broadcast %1 : vector<8x1xf32> to vector<8x32xf32>
    %11 = vector.broadcast %3 : vector<1x32xf32> to vector<8x32xf32>
    %12 = arith.mulf %10, %11 : vector<8x32xf32>
    %13 = arith.addf %9, %12 : vector<8x32xf32>
    %14 = vector.broadcast %4 : vector<1x32xf32> to vector<8x32xf32>
    %15 = arith.addf %13, %14 : vector<8x32xf32>
    %cst_11 = arith.constant 0.000000e+00 : f32
    %16 = vector.broadcast %cst_11 : f32 to vector<8x32xf32>
    %17 = arith.cmpf ogt, %15, %16 : vector<8x32xf32>
    %cst_12 = arith.constant 0.000000e+00 : f32
    %18 = vector.broadcast %cst_12 : f32 to vector<8x32xf32>
    %19 = arith.minimumf %15, %18 : vector<8x32xf32>
    %20 = math.exp %19 : vector<8x32xf32>
    %cst_13 = arith.constant 1.000000e+00 : f32
    %21 = vector.broadcast %cst_13 : f32 to vector<8x32xf32>
    %22 = arith.subf %20, %21 : vector<8x32xf32>
    %23 = arith.select %17, %15, %22 : vector<8x32xi1>, vector<8x32xf32>
    %cst_14 = arith.constant dense<0.000000e+00> : vector<8x32xf32>
    %24 = tpu.matmul %23, %5, %cst_14 {dimension_numbers = #tpu.dot_dimension_numbers<[1], [0], [0], [1], [0, 0, 1, 1], [], []>} : vector<8x32xf32>, vector<32x32xf32>, vector<8x32xf32> -> vector<8x32xf32>
    %25 = vector.broadcast %6 : vector<1x32xf32> to vector<8x32xf32>
    %26 = arith.addf %24, %25 : vector<8x32xf32>
    %cst_15 = arith.constant 0.000000e+00 : f32
    %27 = vector.broadcast %cst_15 : f32 to vector<8x32xf32>
    %28 = arith.cmpf ogt, %26, %27 : vector<8x32xf32>
    %cst_16 = arith.constant 0.000000e+00 : f32
    %29 = vector.broadcast %cst_16 : f32 to vector<8x32xf32>
    %30 = arith.minimumf %26, %29 : vector<8x32xf32>
    %31 = math.exp %30 : vector<8x32xf32>
    %cst_17 = arith.constant 1.000000e+00 : f32
    %32 = vector.broadcast %cst_17 : f32 to vector<8x32xf32>
    %33 = arith.subf %31, %32 : vector<8x32xf32>
    %34 = arith.select %28, %26, %33 : vector<8x32xi1>, vector<8x32xf32>
    %cst_18 = arith.constant dense<0.000000e+00> : vector<8x4xf32>
    %35 = tpu.matmul %34, %7, %cst_18 {dimension_numbers = #tpu.dot_dimension_numbers<[1], [0], [0], [1], [0, 0, 1, 1], [], []>} : vector<8x32xf32>, vector<32x4xf32>, vector<8x4xf32> -> vector<8x4xf32>
    %36 = vector.broadcast %8 : vector<1x4xf32> to vector<8x4xf32>
    %37 = arith.addf %35, %36 : vector<8x4xf32>
    %c0_19 = arith.constant 0 : index
    %c0_20 = arith.constant 0 : index
    %38 = vector.load %arg3[%c0_19, %c0_20] : memref<8x4xf32, #tpu.memory_space<vmem>>, vector<8x4xf32>
    tpu.vector_store %arg3[%c0_19, %c0_20], %37 {strides = array<i32>} : memref<8x4xf32, #tpu.memory_space<vmem>>, vector<8x4xf32>,
    return
  }
}

</mosaic_0001>

<bundles_post_ra>
// kernel: tpu_custom_call.1
= control target key start
LH: loop header
LB: loop body
LE: loop exit
PB: predicated region body
PF: predicated region fallthrough
CT: control target
= control target key end

     0   :  { %vm43_vm0 = vcmask 1043456   ;;  %vm39_vm1 = vcmask 31744   ;;  %v351_v0 = vmov 0.0   ;;  %vm352_vm2 = vmmov 0   ;;  %s426_s2 = inlined_call_operand.vmem [shape: f32[104,32], index: 2, kind: input, shape index: {}]   ;;  %s427_s0 = inlined_call_operand.vmem [shape: f32[8,4], index: 0, kind: input, shape index: {}]   ;;  %s428_s1 = inlined_call_operand.vmem [shape: f32[8,1], index: 1, kind: input, shape index: {}]   ;;  %s429_s3 = inlined_call_operand.vmem [shape: f32[8,4], index: 3, kind: output, shape index: {}]  }
   0x1   :  { %316 = vmatprep.subr.mxu0 %v351_v0  ;;  %v16_v1 = vld [vmem:[%s426_s2] sm:$0xf]  ;;  %318 = vmatprep.mubr.msk.f32.mxu0 %vm352_vm2, %v351_v0  ;;  %v353_v4 = vmov 0   ;;  %v22_v5 = vld [vmem:[%s426_s2 + $0x30] sm:$0xff]  ;;  %v21_v6 = vld [vmem:[%s426_s2 + $0x28] sm:$0xff]  ;;  %vm132_vm3 = vcmask 261120  }
   0x2   :  { %v14_v2 = vld [vmem:[%s427_s0] sm:$0xff]  ;;  %317 = vmatpush3.msk.msra.mxu0 %vm43_vm0, %v16_v1  ;;  %346 = vset.pattern.permute.xlu0 %v353_v4  ;;  %v19_v8 = vld [vmem:[%s426_s2 + $0x18] sm:$0xff]  ;;  %v294_v9 = vld [vmem:[%s426_s2 + $0x8] ss:$0 sm:$0xff] }
   0x3   :  { %v15_v3 = vld [vmem:[%s428_s1] sm:$0xff]  ;;  %319 = vmatmul.mubr.msk.f32.vlgmr.msra.gmra.mxu0 %vm39_vm1, %v14_v2  ;;  %321 = vmatprep.subr.mxu1 %v351_v0  ;;  %v297_v12 = vld [vmem:[%s426_s2 + $0x10] ss:$0 sm:$0xff]  ;;  %v27_v22 = vld [vmem:[%s426_s2 + $0x58] sm:$0xff] }
   0x4   :  { %31 = vperm.xlu0 %346, %v15_v3   ;;  %329 = vmatprep.mubr.msk.f32.mxu1 %vm352_vm2, %v351_v0  ;;  %v20_v7 = vld [vmem:[%s426_s2 + $0x20] sm:$0xff]  ;;  %v26_v23 = vld [vmem:[%s426_s2 + $0x50] sm:$0xff]  ;;  %v25_v24 = vld [vmem:[%s426_s2 + $0x48] sm:$0xff] }
   0x5   :  { %332 = vmatprep.subr.mxu0 %v351_v0  ;;  %340 = vmatprep.mubr.msk.f32.mxu0 %vm352_vm2, %v351_v0  ;;  %v24_v25 = vld [vmem:[%s426_s2 + $0x40] sm:$0xff]  ;;  %v299_v26 = vld [vmem:[%s426_s2 + $0x38] ss:$0 sm:$0xff] }
   0x6   :  { %322 = vmatpush3.msra.mxu1 %v22_v5  ;;  %333 = vmatpush3.msra.mxu0 %v27_v22  ;;  %v302_v35 = vld [vmem:[%s426_s2 + $0x60] ss:$0 sm:$0xff] }
   0x7   :  { %323 = vmatprep.subr.mxu1 %v351_v0  ;;  %334 = vmatprep.subr.mxu0 %v351_v0 }
   0x8   :  { %324 = vmatpush3.msra.mxu1 %v21_v6  ;;  %335 = vmatpush3.msra.mxu0 %v26_v23 }
   0x9   :  { %325 = vmatprep.subr.mxu1 %v351_v0  ;;  %336 = vmatprep.subr.mxu0 %v351_v0 }
   0xa   :  { %326 = vmatpush3.msra.mxu1 %v20_v7  ;;  %337 = vmatpush3.msra.mxu0 %v25_v24 }
   0xb   :  { %327 = vmatprep.subr.mxu1 %v351_v0  ;;  %338 = vmatprep.subr.mxu0 %v351_v0 }
   0xc   :  { %328 = vmatpush3.msra.mxu1 %v19_v8  ;;  %339 = vmatpush3.msra.mxu0 %v24_v25 }
  0x7f   :  { %v32_v10 = vpop.permute.xlu0 %31 }
  0x80   :  { %v38_v11 = vmul.f32 %v294_v9, %v32_v10 }
  0xc3   :  { %v113_v13 = vpop.f32.mrf.mxu0 }
  0xc4   :  { %v114_v14 = vadd.f32 %v113_v13, %v38_v11 }
  0xc5   :  { %v320_v15 = vpop.f32.mrf.mxu0 }
  0xc6   :  { %v121_v16 = vadd.f32 %v297_v12, %v114_v14 }
  0xc8   :  { %v123_v17 = vmin.f32 %v121_v16, 0.0  ;;  %vm122_vm4 = vcmp.gt.f32.partialorder %v121_v16, 0.0 }
  0xca   :  { %v124_v18 = vmul.f32 1.442695, %v123_v17 }
  0xcc   :  { %347 = vpow2.f32 %v124_v18 }
  0xd9   :  { %v348_v19 = vpop.eup %347 }
  0xda   :  { %v298_v20 = vadd.f32 -1.0, %v348_v19 }
  0xdc   :  { %v127_v21 = vsel %vm122_vm4, %v121_v16, %v298_v20 }
  0xdd   :  { %330 = vmatmul.mubr.msk.f32.vlgmr.msra.gmra.mxu1 %vm132_vm3, %v127_v21 }
 0x19d   :  { %v202_v27 = vpop.f32.mrf.mxu1 }
 0x19e   :  { %v203_v28 = vadd.f32 %v299_v26, %v202_v27 }
 0x19f   :  { %v331_v29 = vpop.f32.mrf.mxu1 }
 0x1a0   :  { %v207_v30 = vmin.f32 %v203_v28, 0.0  ;;  %vm206_vm5 = vcmp.gt.f32.partialorder %v203_v28, 0.0 }
 0x1a2   :  { %v208_v31 = vmul.f32 1.442695, %v207_v30 }
 0x1a4   :  { %349 = vpow2.f32 %v208_v31 }
 0x1b1   :  { %v350_v32 = vpop.eup %349 }
 0x1b2   :  { %v301_v33 = vadd.f32 -1.0, %v350_v32 }
 0x1b4   :  { %v211_v34 = vsel %vm206_vm5, %v203_v28, %v301_v33 }
 0x1b5   :  { %341 = vmatmul.mubr.msk.f32.vlgmr.msra.gmra.mxu0 %vm132_vm3, %v211_v34 }
 0x275   :  { %v285_v36 = vpop.f32.mrf.mxu0 }
 0x276   :  { %v286_v37 = vadd.f32 %v302_v35, %v285_v36 }
 0x277   :  { %v342_v38 = vpop.f32.mrf.mxu0 }
 0x278   :  { %289 = vst.msk [vmem:[%s429_s3] sm:$0xff] %vm39_vm1, %v286_v37 }

</bundles_post_ra>
